<compile_context>
chip_gen: v5e
topology: v5e:2x2
jax: 0.10.0
libtpu: 0.0.40
codegen_flags: <defaults>
</compile_context>

<pallas_src>
import functools

import jax
import jax.numpy as jnp
from jax.experimental import pallas as pl
from jax.experimental.pallas import tpu as pltpu

_LANE = 128


def _round_up(x, m):
    return (x + m - 1) // m * m


def _vmem_capacity_bytes():
    # v5e/v6e: 128 MiB, v7x: 64 MiB.  Fall back to the smallest (v7x) size if
    # the trace-time query is unavailable so we never over-subscribe VMEM.
    try:
        return int(pltpu.get_tpu_info().vmem_capacity_bytes)
    except Exception:
        return 64 * 1024 * 1024


def _auto_tiles(bp, state_dim, dtype_bytes):
    """Pick (batch_tile, sub_rows): HBM-efficient DMA tiles that keep the
    lane-padded, double-buffered x tile well inside VMEM on every generation."""
    sub = 512                                    # inner compute sub-tile (rows)
    if bp <= sub:
        return bp, bp                            # tiny batch: single-shot kernel
    # x rows are lane-padded to >=128 lanes in VMEM and double-buffered.
    padded_row_bytes = max(_round_up(state_dim, _LANE), _LANE) * dtype_bytes
    vmem_budget = _vmem_capacity_bytes() // 4    # headroom: outputs/weights/scratch
    tb = (vmem_budget // (2 * padded_row_bytes)) // sub * sub
    # Guarantee >= 2 grid steps so ("parallel",) can shard across both TCs (v7x).
    half = _round_up(pl.cdiv(bp, 2), sub)
    tb = max(sub, min(tb, half, 32768))
    return tb, sub


def _critic_kernel(x_ref, w1_ref, b1_ref, w2_ref, b2_ref, w3_ref, b3_ref,
                   out_ref, *, sub_rows, n_sub):
    # Hoist the tiny, VMEM-pinned parameters out of the inner loop.
    w1 = w1_ref[...]
    b1 = b1_ref[...]
    w2 = w2_ref[...]
    b2 = b2_ref[...]
    w3 = w3_ref[...]
    b3 = b3_ref[0]                               # scalar bias from SMEM

    def body(s, carry):
        r0 = pl.multiple_of(s * sub_rows, sub_rows)
        x = x_ref[pl.ds(r0, sub_rows), :]                             # (sub, S)
        h1 = jnp.dot(x, w1, preferred_element_type=jnp.float32)      # (sub, H)
        h1 = jnp.maximum(h1 + b1, 0.0)
        h2 = jnp.dot(h1, w2, preferred_element_type=jnp.float32)     # (sub, 32)
        h2 = jnp.maximum(h2 + b2, 0.0)
        # Linear(32 -> 1) as VPU multiply + lane reduce -> lane-dense (sub,) row.
        v = jnp.sum(h2 * w3, axis=-1) + b3
        out_ref[0, s, :] = v.astype(out_ref.dtype)
        return carry

    if n_sub == 1:
        body(0, 0)
    else:
        jax.lax.fori_loop(0, n_sub, body, 0, unroll=2)


def critic_forward(state, params, *, block_rows=None, sub_rows=None):
    """state: (B, state_dim) float32.  Returns (B, 1) float32 (same as nn.Module)."""
    w1, b1, w2, b2, w3, b3 = (params["w1"], params["b1"], params["w2"],
                              params["b2"], params["w3"], params["b3"])
    B, S = state.shape
    H = w1.shape[1]
    dt_bytes = jnp.dtype(state.dtype).itemsize

    bp = _round_up(B, _LANE)
    if block_rows is None:
        tb, sub = _auto_tiles(bp, S, dt_bytes)
    else:
        sub = max(_LANE, _round_up(sub_rows or block_rows, _LANE))
        tb = max(sub, _round_up(block_rows, sub))
    n_sub = tb // sub

    # No wrapper-side padding: Pallas masks the partial last input block, and the
    # output rows past B (garbage from uninitialized padding rows) are sliced off.
    grid = (pl.cdiv(B, tb),)

    # VMEM budget derived from actual lane-padded, double-buffered buffer sizes.
    x_buf = 2 * tb * max(_round_up(S, _LANE), _LANE) * dt_bytes
    o_buf = 2 * n_sub * sub * 4
    vmem_limit = min(_vmem_capacity_bytes(),
                     max(16 * 1024 * 1024, x_buf + o_buf + (8 << 20)))

    flops = 2 * B * (S * H + H * 32 + 32)
    bytes_accessed = (B * S + B) * dt_bytes + (S * H + H + H * 32 + 32 + 32 + 1) * 4

    def pinned(shape):                 # VMEM-resident across all grid steps
        return pl.BlockSpec(shape, lambda i: (0,) * len(shape))

    kernel = functools.partial(_critic_kernel, sub_rows=sub, n_sub=n_sub)

    out = pl.pallas_call(
        kernel,
        grid=grid,
        in_specs=[
            pl.BlockSpec((tb, S), lambda i: (i, 0)),            # streamed state tile
            pinned(w1.shape),                                   # (S, H)
            pinned(b1.shape),                                   # (1, H)
            pinned(w2.shape),                                   # (H, 32)
            pinned(b2.shape),                                   # (1, 32)
            pinned(w3.shape),                                   # (1, 32)
            pl.BlockSpec(memory_space=pltpu.MemorySpace.SMEM),  # b3 scalar bias
        ],
        out_specs=pl.BlockSpec((1, n_sub, sub), lambda i: (i, 0, 0)),
        out_shape=jax.ShapeDtypeStruct((grid[0], n_sub, sub), jnp.float32),
        compiler_params=pltpu.CompilerParams(
            dimension_semantics=("parallel",),                  # 2-TC sharding on v7x
            vmem_limit_bytes=int(vmem_limit),
        ),
        cost_estimate=pl.CostEstimate(
            flops=flops, transcendentals=0, bytes_accessed=bytes_accessed),
    )(state, w1, b1, w2, b2, w3, b3)

    return out.reshape(-1)[:B].reshape(B, 1)


def init_critic_params(key, state_dim, hidden_dim):
    """Deterministic init mimicking PyTorch nn.Linear default (uniform +-1/sqrt(fan_in))."""
    ks = jax.random.split(key, 6)

    def lin(kw, kb, fan_in, fan_out):
        bound = 1.0 / jnp.sqrt(jnp.float32(fan_in))
        w = jax.random.uniform(kw, (fan_in, fan_out), jnp.float32, -bound, bound)
        b = jax.random.uniform(kb, (1, fan_out), jnp.float32, -bound, bound)
        return w, b

    w1, b1 = lin(ks[0], ks[1], state_dim, hidden_dim)   # (in, out) layout: y = x @ W + b
    w2, b2 = lin(ks[2], ks[3], hidden_dim, 32)
    bound3 = 1.0 / jnp.sqrt(jnp.float32(32))
    w3 = jax.random.uniform(ks[4], (1, 32), jnp.float32, -bound3, bound3)  # row vec
    b3 = jax.random.uniform(ks[5], (1,), jnp.float32, -bound3, bound3)     # scalar
    return {"w1": w1, "b1": b1, "w2": w2, "b2": b2, "w3": w3, "b3": b3}


def critic_reference(state, params):
    """Pure-JAX reference of the 3-layer MLP (Linear(32->1) written elementwise,
    mathematically identical to h2 @ w3.T + b3)."""
    h1 = jnp.maximum(state @ params["w1"] + params["b1"], 0.0)
    h2 = jnp.maximum(h1 @ params["w2"] + params["b2"], 0.0)
    return jnp.sum(h2 * params["w3"], axis=-1, keepdims=True) + params["b3"]


if __name__ == "__main__":
    key = jax.random.PRNGKey(0)
    k_param, k_state = jax.random.split(key)

    batch, state_dim, hidden_dim = 8, 16, 32
    params = init_critic_params(k_param, state_dim, hidden_dim)
    state = jax.random.normal(k_state, (batch, state_dim), dtype=jnp.float32)
    ref = critic_reference(state, params)

    # Small batch (exact module semantics).
    value = jax.block_until_ready(critic_forward(state, params))
    assert value.shape == (batch, 1)
    assert jnp.allclose(value, ref, atol=1e-4, rtol=1e-4)

    # Ragged batch: multi-step grid with a partial last input block (no jnp.pad)
    # plus the inner sub-tiling loop.
    batch2 = 1500
    state2 = jax.random.normal(jax.random.PRNGKey(1), (batch2, state_dim), jnp.float32)
    value2 = jax.block_until_ready(
        critic_forward(state2, params, block_rows=512, sub_rows=256))
    ref2 = critic_reference(state2, params)
    assert value2.shape == (batch2, 1)
    assert jnp.allclose(value2, ref2, atol=1e-4, rtol=1e-4)

    # Auto-tiled path: >=2 grid steps (both TensorCores on v7x) + inner fori_loop.
    batch3 = 4096
    state3 = jax.random.normal(jax.random.PRNGKey(2), (batch3, state_dim), jnp.float32)
    value3 = jax.block_until_ready(critic_forward(state3, params))
    ref3 = critic_reference(state3, params)
    assert value3.shape == (batch3, 1)
    assert jnp.allclose(value3, ref3, atol=1e-4, rtol=1e-4)

    print("KERNEL_OK")
</pallas_src>

<mosaic_0001>
module attributes {stable_mosaic.version = 11 : i64} {
  func.func @_critic_kernel(%arg0: i32, %arg1: memref<128x16xf32, #tpu.memory_space<vmem>>, %arg2: memref<16x32xf32, #tpu.memory_space<vmem>>, %arg3: memref<1x32xf32, #tpu.memory_space<vmem>>, %arg4: memref<32x32xf32, #tpu.memory_space<vmem>>, %arg5: memref<1x32xf32, #tpu.memory_space<vmem>>, %arg6: memref<1x32xf32, #tpu.memory_space<vmem>>, %arg7: memref<1xf32, #tpu.memory_space<smem>>, %arg8: memref<1x1x128xf32, #tpu.memory_space<vmem>>) attributes {dimension_semantics = [#tpu.dimension_semantics<parallel>], iteration_bounds = array<i64: 1>, scalar_prefetch = 0 : i64, scratch_operands = 0 : i64, tpu.core_type = #tpu.core_type<tc>, window_params = [{transform_indices = @transform_0, window_bounds = array<i64: 128, 16>}, {pipeline_mode = #tpu.pipeline_mode<synchronous>, transform_indices = @transform_1, window_bounds = array<i64: 16, 32>}, {pipeline_mode = #tpu.pipeline_mode<synchronous>, transform_indices = @transform_2, window_bounds = array<i64: 1, 32>}, {pipeline_mode = #tpu.pipeline_mode<synchronous>, transform_indices = @transform_3, window_bounds = array<i64: 32, 32>}, {pipeline_mode = #tpu.pipeline_mode<synchronous>, transform_indices = @transform_4, window_bounds = array<i64: 1, 32>}, {pipeline_mode = #tpu.pipeline_mode<synchronous>, transform_indices = @transform_5, window_bounds = array<i64: 1, 32>}, {transform_indices = @transform_6, window_bounds = array<i64: 1>}, {transform_indices = @transform_7, window_bounds = array<i64: 1, 1, 128>}]} {
    %c0 = arith.constant 0 : index
    %c0_0 = arith.constant 0 : index
    %0 = vector.load %arg2[%c0, %c0_0] : memref<16x32xf32, #tpu.memory_space<vmem>>, vector<16x32xf32>
    %c0_1 = arith.constant 0 : index
    %c0_2 = arith.constant 0 : index
    %1 = vector.load %arg3[%c0_1, %c0_2] : memref<1x32xf32, #tpu.memory_space<vmem>>, vector<1x32xf32>
    %c0_3 = arith.constant 0 : index
    %c0_4 = arith.constant 0 : index
    %2 = vector.load %arg4[%c0_3, %c0_4] : memref<32x32xf32, #tpu.memory_space<vmem>>, vector<32x32xf32>
    %c0_5 = arith.constant 0 : index
    %c0_6 = arith.constant 0 : index
    %3 = vector.load %arg5[%c0_5, %c0_6] : memref<1x32xf32, #tpu.memory_space<vmem>>, vector<1x32xf32>
    %c0_7 = arith.constant 0 : index
    %c0_8 = arith.constant 0 : index
    %4 = vector.load %arg6[%c0_7, %c0_8] : memref<1x32xf32, #tpu.memory_space<vmem>>, vector<1x32xf32>
    %c0_9 = arith.constant 0 : index
    %5 = memref.load %arg7[%c0_9] : memref<1xf32, #tpu.memory_space<smem>>
    %c0_i32 = arith.constant 0 : i32
    %6 = tpu.assume_multiple %c0_i32, 128 : i32
    %7 = arith.index_cast %6 : i32 to index
    %c0_10 = arith.constant 0 : index
    %8 = vector.load %arg1[%7, %c0_10] : memref<128x16xf32, #tpu.memory_space<vmem>>, vector<128x16xf32>
    %cst = arith.constant dense<0.000000e+00> : vector<128x32xf32>
    %9 = tpu.matmul %8, %0, %cst {dimension_numbers = #tpu.dot_dimension_numbers<[1], [0], [0], [1], [0, 0, 1, 1], [], []>} : vector<128x16xf32>, vector<16x32xf32>, vector<128x32xf32> -> vector<128x32xf32>
    %10 = vector.broadcast %1 : vector<1x32xf32> to vector<128x32xf32>
    %11 = arith.addf %9, %10 : vector<128x32xf32>
    %cst_11 = arith.constant 0.000000e+00 : f32
    %12 = vector.broadcast %cst_11 : f32 to vector<128x32xf32>
    %13 = arith.maximumf %11, %12 : vector<128x32xf32>
    %cst_12 = arith.constant dense<0.000000e+00> : vector<128x32xf32>
    %14 = tpu.matmul %13, %2, %cst_12 {dimension_numbers = #tpu.dot_dimension_numbers<[1], [0], [0], [1], [0, 0, 1, 1], [], []>} : vector<128x32xf32>, vector<32x32xf32>, vector<128x32xf32> -> vector<128x32xf32>
    %15 = vector.broadcast %3 : vector<1x32xf32> to vector<128x32xf32>
    %16 = arith.addf %14, %15 : vector<128x32xf32>
    %cst_13 = arith.constant 0.000000e+00 : f32
    %17 = vector.broadcast %cst_13 : f32 to vector<128x32xf32>
    %18 = arith.maximumf %16, %17 : vector<128x32xf32>
    %19 = vector.broadcast %4 : vector<1x32xf32> to vector<128x32xf32>
    %20 = arith.mulf %18, %19 : vector<128x32xf32>
    %cst_14 = arith.constant dense<0.000000e+00> : vector<128xf32>
    %21 = vector.multi_reduction <add>, %20, %cst_14 [1] : vector<128x32xf32> to vector<128xf32>
    %22 = vector.broadcast %5 : f32 to vector<128xf32>
    %23 = arith.addf %21, %22 : vector<128xf32>
    %c0_15 = arith.constant 0 : index
    %c0_16 = arith.constant 0 : index
    %c0_17 = arith.constant 0 : index
    %24 = vector.load %arg8[%c0_15, %c0_16, %c0_17] : memref<1x1x128xf32, #tpu.memory_space<vmem>>, vector<1x1x128xf32>
    %25 = vector.shape_cast %24 : vector<1x1x128xf32> to vector<128xf32>
    %26 = vector.shape_cast %23 : vector<128xf32> to vector<1x1x128xf32>
    tpu.vector_store %arg8[%c0_15, %c0_16, %c0_17], %26 {strides = array<i32>} : memref<1x1x128xf32, #tpu.memory_space<vmem>>, vector<1x1x128xf32>,
    return
  }
  func.func @transform_0(%arg0: i32) -> (i32, i32) {
    %c0_i32 = arith.constant 0 : i32
    %c0_i32_0 = arith.constant 0 : i32
    return %arg0, %c0_i32 : i32, i32
  }
  func.func @transform_1(%arg0: i32) -> (i32, i32) {
    %c0_i32 = arith.constant 0 : i32
    %c0_i32_0 = arith.constant 0 : i32
    %c0_i32_1 = arith.constant 0 : i32
    return %c0_i32, %c0_i32_0 : i32, i32
  }
  func.func @transform_2(%arg0: i32) -> (i32, i32) {
    %c0_i32 = arith.constant 0 : i32
    %c0_i32_0 = arith.constant 0 : i32
    %c0_i32_1 = arith.constant 0 : i32
    return %c0_i32, %c0_i32_0 : i32, i32
  }
  func.func @transform_3(%arg0: i32) -> (i32, i32) {
    %c0_i32 = arith.constant 0 : i32
    %c0_i32_0 = arith.constant 0 : i32
    %c0_i32_1 = arith.constant 0 : i32
    return %c0_i32, %c0_i32_0 : i32, i32
  }
  func.func @transform_4(%arg0: i32) -> (i32, i32) {
    %c0_i32 = arith.constant 0 : i32
    %c0_i32_0 = arith.constant 0 : i32
    %c0_i32_1 = arith.constant 0 : i32
    return %c0_i32, %c0_i32_0 : i32, i32
  }
  func.func @transform_5(%arg0: i32) -> (i32, i32) {
    %c0_i32 = arith.constant 0 : i32
    %c0_i32_0 = arith.constant 0 : i32
    %c0_i32_1 = arith.constant 0 : i32
    return %c0_i32, %c0_i32_0 : i32, i32
  }
  func.func @transform_6(%arg0: i32) -> i32 {
    %c0_i32 = arith.constant 0 : i32
    %c0_i32_0 = arith.constant 0 : i32
    return %c0_i32 : i32
  }
  func.func @transform_7(%arg0: i32) -> (i32, i32, i32) {
    %c0_i32 = arith.constant 0 : i32
    %c0_i32_0 = arith.constant 0 : i32
    %c0_i32_1 = arith.constant 0 : i32
    return %arg0, %c0_i32, %c0_i32_0 : i32, i32, i32
  }
}

</mosaic_0001>

<bundles_post_ra>
// kernel: tpu_custom_call.1
= control target key start
LH: loop header
LB: loop body
LE: loop exit
PB: predicated region body
PF: predicated region fallthrough
CT: control target
= control target key end

     0   :  { %13 = vsyncpa [#allocation4], 0  ;;  %s914_s0 = inlined_call_operand.hbm [shape: f32[8,16], index: 0, kind: input, shape index: {}]   ;;  %s915_s1 = inlined_call_operand.hbm [shape: f32[16,32], index: 1, kind: input, shape index: {}]   ;;  %s916_s2 = inlined_call_operand.vmem [shape: f32[1,32], index: 2, kind: input, shape index: {}]   ;;  %s917_s3 = inlined_call_operand.hbm [shape: f32[32,32], index: 3, kind: input, shape index: {}]   ;;  %s918_s4 = inlined_call_operand.vmem [shape: f32[1,32], index: 4, kind: input, shape index: {}]   ;;  %s919_s5 = inlined_call_operand.vmem [shape: f32[1,32], index: 5, kind: input, shape index: {}]   ;;  %s920_s6 = inlined_call_operand.<no memory space> [shape: f32[1], index: 6, kind: input, shape index: {}]   ;;  %s921_s7 = inlined_call_operand.hbm [shape: f32[1,1,128], index: 7, kind: output, shape index: {}]  }
   0x1   :  { %14 = vsyncpa [#allocation7], 0 }
   0x2   :  { %15 = vsyncpa [#allocation5], 0 }
   0x3   :  { %19 = vsyncadd [#allocation4], 1920  ;;  %s33_s26 = sshll.u32 %s915_s1, 4  ;;  %s699_s27 = smov [#allocation6]   ;;  %s34_s26 = int_to_ptr.hbm [resolvable:$true] %s33_s26 }
   0x4   :  { %s35_s28 = sshll.u32 %s699_s27, 4  ;;  %s20_s8 = sshll.u32 %s914_s0, 4  ;;  %s36_s28 = int_to_ptr.vmem [resolvable:$true] %s35_s28  ;;  %s21_s8 = int_to_ptr.hbm [resolvable:$true] %s20_s8 }
   0x5   :  { %s700_s9 = smov 128   ;;  %s701_s10 = smov 8  }
   0x6   :  { %41 = dma.hbm_to_vmem [thread:$0]  %s34_s26, 256, %s36_s28, [#allocation7], %s700_s9, %s700_s9, %s701_s10  }
   0x7   :  { %s702_s11 = smov [#allocation3]   ;;  %s48_s15 = sshll.u32 %s917_s3, 4  ;;  %s49_s15 = int_to_ptr.hbm [resolvable:$true] %s48_s15 }
   0x8   :  { %s22_s12 = sshll.u32 %s702_s11, 4  ;;  %s703_s1 = smov [#allocation8]   ;;  %s23_s12 = int_to_ptr.vmem [resolvable:$true] %s22_s12 }
   0x9   :  { %28 = dma.hbm_to_vmem [thread:$0]  %s21_s8, 128, %s23_s12, [#allocation4], %s700_s9, %s700_s9, %s701_s10  }
   0xa   :  { %s50_s16 = sshll.u32 %s703_s1, 4  ;;  %s51_s16 = int_to_ptr.vmem [resolvable:$true] %s50_s16 }
   0xb   :  { %56 = dma.hbm_to_vmem [thread:$0]  %s49_s15, 512, %s51_s16, [#allocation7], %s700_s9, %s700_s9, %s701_s10  }
   0xc   :  { %693 = dma.done.wait [#allocation4], 2048  }
   0xd   :  { %694 = vsyncadd [#allocation4], 4294965248 }
   0xe   :  { %695 = dma.done.wait [#allocation7], 768  }
   0xf   :  { %696 = vsyncadd [#allocation7], 4294966528  ;;  %v76_v0 = vld [vmem:[#allocation6 + $0x8] sm:$0xff]  ;;  %v75_v1 = vld [vmem:[#allocation6] sm:$0xff]  ;;  %vm104_vm0 = vcmask 130048   ;;  %vm237_vm1 = vcmask 261120  }
  0x10   :  { %167 = vmatpush.msra.mxu0 %v76_v0  ;;  %v85_v2 = vld [vmem:[#allocation3] sm:$0xff]  ;;  %582 = vmatpush.msra.mxu3 %v76_v0  ;;  %v86_v3 = vld [vmem:[#allocation3 + $0x8] sm:$0xff]  ;;  %v87_v4 = vld [vmem:[#allocation3 + $0x10] sm:$0xff]  ;;  %vm472_vm2 = vcmask 130112   ;;  %vm476_vm3 = vcmask 195712   ;;  %vm480_vm4 = vcmask 261312  }
  0x11   :  { %v88_v5 = vld [vmem:[#allocation3 + $0x18] sm:$0xff]  ;;  %v89_v6 = vld [vmem:[#allocation3 + $0x20] sm:$0xff]  ;;  %v94_v7 = vld [vmem:[#allocation3 + $0x48] sm:$0xff]  ;;  %vm484_vm5 = vcmask 326912   ;;  %vm488_vm6 = vcmask 392512   ;;  %vm492_vm7 = vcmask 458112  }
  0x12   :  { %168 = vmatpush.msra.mxu0 %v75_v1  ;;  %583 = vmatpush.msra.mxu3 %v75_v1  ;;  %v90_v8 = vld [vmem:[#allocation3 + $0x28] sm:$0xff]  ;;  %v95_v9 = vld [vmem:[#allocation3 + $0x50] sm:$0xff]  ;;  %v96_v11 = vld [vmem:[#allocation3 + $0x58] sm:$0xff]  ;;  %vm496_vm8 = vcmask 523712   ;;  %vm500_vm9 = vcmask 589312   ;;  %vm504_vm10 = vcmask 654912  }
  0x13   :  { %550 = vmatmul.msk.f32.vlgmr.msra.gmra.mxu0 %vm104_vm0, %v85_v2  ;;  %559 = vmatmul.msk.f32.vlgmr.msra.gmra.mxu3 %vm104_vm0, %v94_v7  ;;  %v91_v10 = vld [vmem:[#allocation3 + $0x30] sm:$0xff]  ;;  %v81_v12 = vld [vmem:[#allocation8 + $0x18] sm:$0xff]  ;;  %v92_v13 = vld [vmem:[#allocation3 + $0x38] sm:$0xff]  ;;  %vm508_vm11 = vcmask 720512   ;;  %vm512_vm12 = vcmask 786112   ;;  %vm516_vm13 = vcmask 851712  }
  0x14   :  { %298 = vmatpush.msra.mxu1 %v81_v12  ;;  %584 = vmatpush.msra.mxu2 %v81_v12  ;;  %v97_v14 = vld [vmem:[#allocation3 + $0x60] sm:$0xff]  ;;  %v98_v16 = vld [vmem:[#allocation3 + $0x68] sm:$0xff]  ;;  %v99_v17 = vld [vmem:[#allocation3 + $0x70] sm:$0xff]  ;;  %vm520_vm14 = vcmask 917312   ;;  %vm524_vm15 = vcmask 982912   ;;  %s539_s23 = sshll.u32 %s921_s7, 4  ;;  %s540_s23 = int_to_ptr.hbm [resolvable:$true] %s539_s23 }
  0x15   :  { %v93_v15 = vld [vmem:[#allocation3 + $0x40] sm:$0xff]  ;;  %v100_v18 = vld [vmem:[#allocation3 + $0x78] sm:$0xff]  ;;  %v78_v21 = vld [vmem:[#allocation8] sm:$0xff] }
  0x16   :  { %v80_v19 = vld [vmem:[#allocation8 + $0x10] sm:$0xff]  ;;  %v79_v20 = vld [vmem:[#allocation8 + $0x8] sm:$0xff] }
  0x17   :  { %299 = vmatpush.msra.mxu1 %v80_v19  ;;  %585 = vmatpush.msra.mxu2 %v80_v19  ;;  %v773_v22 = vld [vmem:[%s916_s2] ss:$0 sm:$0xff] }
  0x18   :  { %v810_v7 = vld [vmem:[%s918_s4] ss:$0 sm:$0xff] }
  0x19   :  { %300 = vmatpush.msra.mxu1 %v79_v20  ;;  %586 = vmatpush.msra.mxu2 %v79_v20 }
  0x1b   :  { %551 = vmatmul.msk.f32.gmra.mxu0 %vm104_vm0, %v86_v3  ;;  %560 = vmatmul.msk.f32.gmra.mxu3 %vm104_vm0, %v95_v9 }
  0x1c   :  { %301 = vmatpush.msra.mxu1 %v78_v21  ;;  %587 = vmatpush.msra.mxu2 %v78_v21 }
  0x23   :  { %552 = vmatmul.msk.f32.gmra.mxu0 %vm104_vm0, %v87_v4  ;;  %561 = vmatmul.msk.f32.gmra.mxu3 %vm104_vm0, %v96_v11 }
  0x2b   :  { %553 = vmatmul.msk.f32.gmra.mxu0 %vm104_vm0, %v88_v5  ;;  %562 = vmatmul.msk.f32.gmra.mxu3 %vm104_vm0, %v97_v14 }
  0x33   :  { %554 = vmatmul.msk.f32.gmra.mxu0 %vm104_vm0, %v89_v6  ;;  %563 = vmatmul.msk.f32.gmra.mxu3 %vm104_vm0, %v98_v16 }
  0x3b   :  { %555 = vmatmul.msk.f32.gmra.mxu0 %vm104_vm0, %v90_v8  ;;  %564 = vmatmul.msk.f32.gmra.mxu3 %vm104_vm0, %v99_v17 }
  0x43   :  { %556 = vmatmul.msk.f32.gmra.mxu0 %vm104_vm0, %v91_v10  ;;  %565 = vmatmul.msk.f32.gmra.mxu3 %vm104_vm0, %v100_v18  ;;  %v816_v10 = vld [vmem:[%s919_s5] ss:$0 sm:$0xff] }
  0x4b   :  { %557 = vmatmul.msk.f32.gmra.mxu0 %vm104_vm0, %v92_v13 }
  0x53   :  { %558 = vmatmul.msk.f32.gmra.mxu0 %vm104_vm0, %v93_v15  ;;  %vm528_vm0 = vcmask 1048512  }
  0x90   :  { %v170_v23 = vpop.f32.mrf.mxu0 }
  0x91   :  { %v171_v24 = vadd.f32 %v773_v22, %v170_v23 }
  0x93   :  { %v218_v25 = vmax.f32 %v171_v24, 0.0 }
  0x95   :  { %566 = vmatmul.msk.f32.vlgmr.msra.gmra.mxu1 %vm237_vm1, %v218_v25 }
  0x96   :  { %v197_v44 = vpop.f32.mrf.mxu3 }
  0x97   :  { %v198_v52 = vadd.f32 %v773_v22, %v197_v44 }
  0x98   :  { %v173_v26 = vpop.f32.mrf.mxu0 }
  0x99   :  { %v174_v27 = vadd.f32 %v773_v22, %v173_v26  ;;  %v227_v53 = vmax.f32 %v198_v52, 0.0 }
  0x9b   :  { %v219_v28 = vmax.f32 %v174_v27, 0.0 }
  0x9d   :  { %567 = vmatmul.msk.f32.gmra.mxu1 %vm237_vm1, %v219_v28 }
  0x9e   :  { %v200_v49 = vpop.f32.mrf.mxu3 }
  0x9f   :  { %v201_v55 = vadd.f32 %v773_v22, %v200_v49 }
  0xa0   :  { %v176_v29 = vpop.f32.mrf.mxu0 }
  0xa1   :  { %v177_v30 = vadd.f32 %v773_v22, %v176_v29  ;;  %v228_v56 = vmax.f32 %v201_v55, 0.0 }
  0xa3   :  { %v220_v31 = vmax.f32 %v177_v30, 0.0 }
  0xa5   :  { %568 = vmatmul.msk.f32.gmra.mxu1 %vm237_vm1, %v220_v31 }
  0xa6   :  { %v203_v54 = vpop.f32.mrf.mxu3 }
  0xa7   :  { %v204_v58 = vadd.f32 %v773_v22, %v203_v54 }
  0xa8   :  { %v179_v32 = vpop.f32.mrf.mxu0 }
  0xa9   :  { %v180_v33 = vadd.f32 %v773_v22, %v179_v32  ;;  %v229_v59 = vmax.f32 %v204_v58, 0.0 }
  0xab   :  { %v221_v34 = vmax.f32 %v180_v33, 0.0 }
  0xad   :  { %569 = vmatmul.msk.f32.gmra.mxu1 %vm237_vm1, %v221_v34 }
  0xae   :  { %v206_v57 = vpop.f32.mrf.mxu3 }
  0xaf   :  { %v207_v60 = vadd.f32 %v773_v22, %v206_v57 }
  0xb0   :  { %v182_v35 = vpop.f32.mrf.mxu0 }
  0xb1   :  { %v183_v36 = vadd.f32 %v773_v22, %v182_v35  ;;  %v230_v62 = vmax.f32 %v207_v60, 0.0 }
  0xb3   :  { %v222_v37 = vmax.f32 %v183_v36, 0.0 }
  0xb5   :  { %570 = vmatmul.msk.f32.gmra.mxu1 %vm237_vm1, %v222_v37 }
  0xb6   :  { %v209_v61 = vpop.f32.mrf.mxu3 }
  0xb7   :  { %v210_v63 = vadd.f32 %v773_v22, %v209_v61 }
  0xb8   :  { %v185_v38 = vpop.f32.mrf.mxu0 }
  0xb9   :  { %v186_v39 = vadd.f32 %v773_v22, %v185_v38  ;;  %v231_v1 = vmax.f32 %v210_v63, 0.0 }
  0xbb   :  { %v223_v40 = vmax.f32 %v186_v39, 0.0 }
  0xbd   :  { %571 = vmatmul.msk.f32.gmra.mxu1 %vm237_vm1, %v223_v40 }
  0xbe   :  { %v212_v0 = vpop.f32.mrf.mxu3 }
  0xbf   :  { %v213_v2 = vadd.f32 %v773_v22, %v212_v0 }
  0xc0   :  { %v188_v41 = vpop.f32.mrf.mxu0 }
  0xc1   :  { %v189_v42 = vadd.f32 %v773_v22, %v188_v41  ;;  %v232_v3 = vmax.f32 %v213_v2, 0.0 }
  0xc3   :  { %v224_v43 = vmax.f32 %v189_v42, 0.0 }
  0xc5   :  { %572 = vmatmul.msk.f32.gmra.mxu1 %vm237_vm1, %v224_v43 }
  0xc6   :  { %v215_v4 = vpop.f32.mrf.mxu3 }
  0xc7   :  { %v216_v5 = vadd.f32 %v773_v22, %v215_v4 }
  0xc8   :  { %v191_v45 = vpop.f32.mrf.mxu0 }
  0xc9   :  { %v192_v46 = vadd.f32 %v773_v22, %v191_v45  ;;  %v233_v6 = vmax.f32 %v216_v5, 0.0 }
  0xcb   :  { %v225_v47 = vmax.f32 %v192_v46, 0.0 }
  0xcd   :  { %573 = vmatmul.msk.f32.gmra.mxu1 %vm237_vm1, %v225_v47 }
  0xd0   :  { %v194_v48 = vpop.f32.mrf.mxu0 }
  0xd1   :  { %v195_v50 = vadd.f32 %v773_v22, %v194_v48 }
  0xd3   :  { %v226_v51 = vmax.f32 %v195_v50, 0.0 }
  0xd5   :  { %574 = vmatmul.msk.f32.vlgmr.msra.gmra.mxu2 %vm237_vm1, %v226_v51 }
  0xdd   :  { %575 = vmatmul.msk.f32.gmra.mxu2 %vm237_vm1, %v227_v53 }
  0xe5   :  { %576 = vmatmul.msk.f32.gmra.mxu2 %vm237_vm1, %v228_v56 }
  0xed   :  { %577 = vmatmul.msk.f32.gmra.mxu2 %vm237_vm1, %v229_v59 }
  0xf5   :  { %578 = vmatmul.msk.f32.gmra.mxu2 %vm237_vm1, %v230_v62 }
  0xfd   :  { %579 = vmatmul.msk.f32.gmra.mxu2 %vm237_vm1, %v231_v1 }
 0x105   :  { %580 = vmatmul.msk.f32.gmra.mxu2 %vm237_vm1, %v232_v3 }
 0x10d   :  { %581 = vmatmul.msk.f32.gmra.mxu2 %vm237_vm1, %v233_v6 }
 0x112   :  { %v303_v8 = vpop.f32.mrf.mxu1 }
 0x113   :  { %v304_v9 = vadd.f32 %v810_v7, %v303_v8 }
 0x115   :  { %v351_v11 = vmax.f32 %v304_v9, 0.0 }
 0x117   :  { %v370_v12 = vmul.f32 %v816_v10, %v351_v11 }
 0x119   :  { %v386_v13 = vsel %vm237_vm1, %v370_v12, 0.0 }
 0x11a   :  { %v306_v14 = vpop.f32.mrf.mxu1  ;;  %387 = vadd.xlane.f32.xlu0 %v386_v13 }
 0x11b   :  { %v307_v15 = vadd.f32 %v810_v7, %v306_v14 }
 0x11d   :  { %v352_v16 = vmax.f32 %v307_v15, 0.0 }
 0x11f   :  { %v371_v17 = vmul.f32 %v816_v10, %v352_v16 }
 0x121   :  { %v389_v18 = vsel %vm237_vm1, %v371_v17, 0.0 }
 0x122   :  { %v309_v19 = vpop.f32.mrf.mxu1  ;;  %390 = vadd.xlane.f32.xlu0 %v389_v18 }
 0x123   :  { %v310_v20 = vadd.f32 %v810_v7, %v309_v19 }
 0x125   :  { %v353_v21 = vmax.f32 %v310_v20, 0.0 }
 0x127   :  { %v372_v22 = vmul.f32 %v816_v10, %v353_v21 }
 0x129   :  { %v392_v23 = vsel %vm237_vm1, %v372_v22, 0.0 }
 0x12a   :  { %v312_v24 = vpop.f32.mrf.mxu1  ;;  %393 = vadd.xlane.f32.xlu1 %v392_v23 }
 0x12b   :  { %v313_v25 = vadd.f32 %v810_v7, %v312_v24 }
 0x12d   :  { %v354_v26 = vmax.f32 %v313_v25, 0.0 }
 0x12f   :  { %v373_v27 = vmul.f32 %v816_v10, %v354_v26 }
 0x131   :  { %v395_v28 = vsel %vm237_vm1, %v373_v27, 0.0 }
 0x132   :  { %v315_v29 = vpop.f32.mrf.mxu1  ;;  %396 = vadd.xlane.f32.xlu1 %v395_v28 }
 0x133   :  { %v316_v30 = vadd.f32 %v810_v7, %v315_v29 }
 0x135   :  { %v355_v31 = vmax.f32 %v316_v30, 0.0 }
 0x137   :  { %v374_v32 = vmul.f32 %v816_v10, %v355_v31 }
 0x139   :  { %v398_v33 = vsel %vm237_vm1, %v374_v32, 0.0 }
 0x13a   :  { %v318_v34 = vpop.f32.mrf.mxu1  ;;  %399 = vadd.xlane.f32.xlu2 %v398_v33  ;;  %v467_v33 = vlaneseq }
 0x13b   :  { %v319_v35 = vadd.f32 %v810_v7, %v318_v34 }
 0x13d   :  { %v356_v36 = vmax.f32 %v319_v35, 0.0 }
 0x13f   :  { %v375_v37 = vmul.f32 %v816_v10, %v356_v36 }
 0x141   :  { %v401_v38 = vsel %vm237_vm1, %v375_v37, 0.0  ;;  %v865_v37 = vand.u32 127, %v467_v33 }
 0x142   :  { %v321_v39 = vpop.f32.mrf.mxu1  ;;  %402 = vadd.xlane.f32.xlu2 %v401_v38 }
 0x143   :  { %v322_v40 = vadd.f32 %v810_v7, %v321_v39  ;;  %v526_v33 = vadd.s32 4294967176, %v865_v37 }
 0x145   :  { %v357_v41 = vmax.f32 %v322_v40, 0.0  ;;  %v474_v40 = vadd.s32 4294967280, %v865_v37 }
 0x147   :  { %v376_v42 = vmul.f32 %v816_v10, %v357_v41 }
 0x149   :  { %v404_v43 = vsel %vm237_vm1, %v376_v42, 0.0  ;;  %v478_v42 = vadd.s32 4294967272, %v865_v37 }
 0x14a   :  { %v324_v44 = vpop.f32.mrf.mxu1  ;;  %405 = vadd.xlane.f32.xlu0 %v404_v43 }
 0x14b   :  { %v325_v45 = vadd.f32 %v810_v7, %v324_v44 }
 0x14d   :  { %v358_v46 = vmax.f32 %v325_v45, 0.0 }
 0x14f   :  { %v377_v47 = vmul.f32 %v816_v10, %v358_v46 }
 0x151   :  { %v407_v48 = vsel %vm237_vm1, %v377_v47, 0.0  ;;  %v482_v47 = vadd.s32 4294967264, %v865_v37 }
 0x152   :  { %408 = vadd.xlane.f32.xlu1 %v407_v48 }
 0x158   :  { %v327_v49 = vpop.f32.mrf.mxu2 }
 0x159   :  { %v328_v50 = vadd.f32 %v810_v7, %v327_v49 }
 0x15b   :  { %v359_v51 = vmax.f32 %v328_v50, 0.0 }
 0x15d   :  { %v378_v52 = vmul.f32 %v816_v10, %v359_v51 }
 0x15f   :  { %v410_v53 = vsel %vm237_vm1, %v378_v52, 0.0 }
 0x160   :  { %v330_v54 = vpop.f32.mrf.mxu2  ;;  %411 = vadd.xlane.f32.xlu2 %v410_v53  ;;  %v486_v53 = vadd.s32 4294967256, %v865_v37 }
 0x161   :  { %v331_v55 = vadd.f32 %v810_v7, %v330_v54 }
 0x163   :  { %v360_v56 = vmax.f32 %v331_v55, 0.0 }
 0x165   :  { %v379_v57 = vmul.f32 %v816_v10, %v360_v56  ;;  %v490_v56 = vadd.s32 4294967248, %v865_v37 }
 0x167   :  { %v413_v58 = vsel %vm237_vm1, %v379_v57, 0.0 }
 0x168   :  { %v333_v59 = vpop.f32.mrf.mxu2  ;;  %414 = vadd.xlane.f32.xlu0 %v413_v58 }
 0x169   :  { %v334_v60 = vadd.f32 %v810_v7, %v333_v59  ;;  %v494_v59 = vadd.s32 4294967240, %v865_v37 }
 0x16b   :  { %v361_v61 = vmax.f32 %v334_v60, 0.0 }
 0x16d   :  { %v380_v62 = vmul.f32 %v816_v10, %v361_v61 }
 0x16f   :  { %v416_v63 = vsel %vm237_vm1, %v380_v62, 0.0  ;;  %v498_v62 = vadd.s32 4294967232, %v865_v37 }
 0x170   :  { %v336_v0 = vpop.f32.mrf.mxu2  ;;  %417 = vadd.xlane.f32.xlu1 %v416_v63 }
 0x171   :  { %v337_v1 = vadd.f32 %v810_v7, %v336_v0 }
 0x173   :  { %v362_v2 = vmax.f32 %v337_v1, 0.0 }
 0x175   :  { %v381_v3 = vmul.f32 %v816_v10, %v362_v2  ;;  %v502_v2 = vadd.s32 4294967224, %v865_v37 }
 0x177   :  { %v419_v4 = vsel %vm237_vm1, %v381_v3, 0.0 }
 0x178   :  { %v339_v5 = vpop.f32.mrf.mxu2  ;;  %420 = vadd.xlane.f32.xlu2 %v419_v4 }
 0x179   :  { %v340_v6 = vadd.f32 %v810_v7, %v339_v5 }
 0x17b   :  { %v363_v8 = vmax.f32 %v340_v6, 0.0  ;;  %v506_v6 = vadd.s32 4294967216, %v865_v37 }
 0x17d   :  { %v382_v9 = vmul.f32 %v816_v10, %v363_v8 }
 0x17f   :  { %v422_v11 = vsel %vm237_vm1, %v382_v9, 0.0 }
 0x180   :  { %v342_v12 = vpop.f32.mrf.mxu2  ;;  %423 = vadd.xlane.f32.xlu0 %v422_v11 }
 0x181   :  { %v343_v13 = vadd.f32 %v810_v7, %v342_v12 }
 0x183   :  { %v364_v14 = vmax.f32 %v343_v13, 0.0  ;;  %v510_v13 = vadd.s32 4294967208, %v865_v37 }
 0x185   :  { %v383_v15 = vmul.f32 %v816_v10, %v364_v14 }
 0x187   :  { %v425_v16 = vsel %vm237_vm1, %v383_v15, 0.0 }
 0x188   :  { %v345_v17 = vpop.f32.mrf.mxu2  ;;  %426 = vadd.xlane.f32.xlu1 %v425_v16 }
 0x189   :  { %v346_v18 = vadd.f32 %v810_v7, %v345_v17  ;;  %v514_v17 = vadd.s32 4294967200, %v865_v37 }
 0x18b   :  { %v365_v19 = vmax.f32 %v346_v18, 0.0 }
 0x18d   :  { %v384_v20 = vmul.f32 %v816_v10, %v365_v19  ;;  %v388_v27 = vpop.xlane.xlu0 %387 }
 0x18f   :  { %v428_v21 = vsel %vm237_vm1, %v384_v20, 0.0 }
 0x190   :  { %v348_v22 = vpop.f32.mrf.mxu2  ;;  %429 = vadd.xlane.f32.xlu2 %v428_v21  ;;  %v518_v21 = vadd.s32 4294967192, %v865_v37 }
 0x191   :  { %v349_v23 = vadd.f32 %v810_v7, %v348_v22  ;;  %v870_v7 = vstv %s920_s6  ;;  %s704_s6 = smov [#allocation9]  }
 0x192   :  { %v435_v39 = vadd.f32 %v870_v7, %v388_v27  ;;  %s537_s20 = sshll.u32 %s704_s6, 4  ;;  %s538_s20 = int_to_ptr.vmem [resolvable:$true] %s537_s20 }
 0x193   :  { %v366_v24 = vmax.f32 %v349_v23, 0.0 }
 0x194   :  { %v469_v50 = vperm.slane %v435_v39, %v865_v37 }
 0x195   :  { %v385_v25 = vmul.f32 %v816_v10, %v366_v24  ;;  %v391_v30 = vpop.xlane.xlu0 %390  ;;  %v470_v10 = vadd.s32 4294967288, %v865_v37 }
 0x196   :  { %v436_v38 = vadd.f32 %v870_v7, %v391_v30 }
 0x197   :  { %v431_v26 = vsel %vm237_vm1, %v385_v25, 0.0  ;;  %v522_v25 = vadd.s32 4294967184, %v865_v37 }
 0x198   :  { %432 = vadd.xlane.f32.xlu0 %v431_v26  ;;  %v471_v45 = vperm.slane %v436_v38, %v470_v10 }
 0x19a   :  { %v473_v55 = vsel %vm472_vm2, %v471_v45, %v469_v50 }
 0x19d   :  { %v394_v28 = vpop.xlane.xlu1 %393 }
 0x19e   :  { %v437_v41 = vadd.f32 %v870_v7, %v394_v28 }
 0x1a0   :  { %v475_v51 = vperm.slane %v437_v41, %v474_v40 }
 0x1a2   :  { %v477_v61 = vsel %vm476_vm3, %v475_v51, %v473_v55 }
 0x1a5   :  { %v397_v31 = vpop.xlane.xlu1 %396 }
 0x1a6   :  { %v438_v43 = vadd.f32 %v870_v7, %v397_v31 }
 0x1a8   :  { %v479_v52 = vperm.slane %v438_v43, %v478_v42 }
 0x1aa   :  { %v481_v0 = vsel %vm480_vm4, %v479_v52, %v477_v61 }
 0x1ad   :  { %v400_v29 = vpop.xlane.xlu2 %399 }
 0x1ae   :  { %v439_v48 = vadd.f32 %v870_v7, %v400_v29 }
 0x1b0   :  { %v483_v58 = vperm.slane %v439_v48, %v482_v47 }
 0x1b2   :  { %v485_v11 = vsel %vm484_vm5, %v483_v58, %v481_v0 }
 0x1b5   :  { %v403_v32 = vpop.xlane.xlu2 %402 }
 0x1b6   :  { %v440_v54 = vadd.f32 %v870_v7, %v403_v32 }
 0x1b8   :  { %v487_v1 = vperm.slane %v440_v54, %v486_v53 }
 0x1ba   :  { %v489_v19 = vsel %vm488_vm6, %v487_v1, %v485_v11 }
 0x1bd   :  { %v406_v34 = vpop.xlane.xlu0 %405 }
 0x1be   :  { %v441_v57 = vadd.f32 %v870_v7, %v406_v34 }
 0x1c0   :  { %v491_v5 = vperm.slane %v441_v57, %v490_v56 }
 0x1c2   :  { %v493_v23 = vsel %vm492_vm7, %v491_v5, %v489_v19 }
 0x1c5   :  { %v409_v35 = vpop.xlane.xlu1 %408 }
 0x1c6   :  { %v442_v60 = vadd.f32 %v870_v7, %v409_v35 }
 0x1c8   :  { %v495_v12 = vperm.slane %v442_v60, %v494_v59 }
 0x1ca   :  { %v497_v27 = vsel %vm496_vm8, %v495_v12, %v493_v23 }
 0x1d3   :  { %v412_v36 = vpop.xlane.xlu2 %411 }
 0x1d4   :  { %v443_v63 = vadd.f32 %v870_v7, %v412_v36 }
 0x1d6   :  { %v499_v16 = vperm.slane %v443_v63, %v498_v62 }
 0x1d8   :  { %v501_v29 = vsel %vm500_vm9, %v499_v16, %v497_v27 }
 0x1db   :  { %v415_v44 = vpop.xlane.xlu0 %414 }
 0x1dc   :  { %v444_v3 = vadd.f32 %v870_v7, %v415_v44 }
 0x1de   :  { %v503_v20 = vperm.slane %v444_v3, %v502_v2 }
 0x1e0   :  { %v505_v31 = vsel %vm504_vm10, %v503_v20, %v501_v29 }
 0x1e3   :  { %v418_v46 = vpop.xlane.xlu1 %417 }
 0x1e4   :  { %v445_v8 = vadd.f32 %v870_v7, %v418_v46 }
 0x1e6   :  { %v507_v24 = vperm.slane %v445_v8, %v506_v6 }
 0x1e8   :  { %v509_v34 = vsel %vm508_vm11, %v507_v24, %v505_v31 }
 0x1eb   :  { %v421_v49 = vpop.xlane.xlu2 %420 }
 0x1ec   :  { %v446_v14 = vadd.f32 %v870_v7, %v421_v49 }
 0x1ee   :  { %v511_v28 = vperm.slane %v446_v14, %v510_v13 }
 0x1f0   :  { %v513_v10 = vsel %vm512_vm12, %v511_v28, %v509_v34 }
 0x1f3   :  { %v424_v4 = vpop.xlane.xlu0 %423 }
 0x1f4   :  { %v447_v18 = vadd.f32 %v870_v7, %v424_v4 }
 0x1f6   :  { %v515_v30 = vperm.slane %v447_v18, %v514_v17 }
 0x1f8   :  { %v517_v39 = vsel %vm516_vm13, %v515_v30, %v513_v10 }
 0x1fb   :  { %v427_v9 = vpop.xlane.xlu1 %426 }
 0x1fc   :  { %v448_v22 = vadd.f32 %v870_v7, %v427_v9 }
 0x1fe   :  { %v519_v32 = vperm.slane %v448_v22, %v518_v21 }
 0x200   :  { %v521_v40 = vsel %vm520_vm14, %v519_v32, %v517_v39 }
 0x203   :  { %v430_v15 = vpop.xlane.xlu2 %429 }
 0x204   :  { %v449_v26 = vadd.f32 %v870_v7, %v430_v15 }
 0x206   :  { %v523_v35 = vperm.slane %v449_v26, %v522_v25 }
 0x208   :  { %v525_v42 = vsel %vm524_vm15, %v523_v35, %v521_v40 }
 0x20b   :  { %v433_v36 = vpop.xlane.xlu0 %432 }
 0x20c   :  { %v450_v38 = vadd.f32 %v870_v7, %v433_v36 }
 0x20e   :  { %v527_v41 = vperm.slane %v450_v38, %v526_v33 }
 0x210   :  { %v529_v37 = vsel %vm528_vm0, %v527_v41, %v525_v42 }
 0x211   :  { %531 = vst [vmem:[#allocation9] sm:$0x1] %v529_v37 }
 0x212   :  { %542 = dma.vmem_to_hbm [thread:$0]  %s538_s20, 16, %s540_s23, [#allocation5]  }
 0x213   :  { %697 = dma.done.wait [#allocation5], 16  }
 0x214   :  { %698 = vsyncadd [#allocation5], 4294967280 }
 0x215   :  { %547 = vsyncpa [#allocation4], 1 }
 0x216   :  { %548 = vsyncpa [#allocation7], 1 }
 0x217   :  { %549 = vsyncpa [#allocation5], 1 }

</bundles_post_ra>
